<compile_context>
chip_gen: v7x
topology: tpu7x:2x2x1
jax: 0.10.0
libtpu: 0.0.40
codegen_flags: <defaults>
</compile_context>

<pallas_src>
import functools

import jax
import jax.numpy as jnp
from jax import lax
from jax.experimental import pallas as pl
from jax.experimental.pallas import tpu as pltpu


# ---------------------------------------------------------------------------
# Phase 1: accumulate raw per-path contexts  ctx[e, f] = sum_n k[n, e] v[n, f]
# over token tiles (grid axis 1 is the reduction axis, "arbitrary").
# ---------------------------------------------------------------------------
def _ctx_kernel(x1_ref, x2_ref, x3_ref,
                wu1_ref, bu1_ref, wu2_ref, bu2_ref,
                wkv1_ref, wkv2_ref, wkv3_ref,
                c1_ref, c2_ref, c3_ref,
                *, d, n_tokens, needs_mask):
    f32 = jnp.float32
    n = pl.program_id(1)

    @pl.when(n == 0)
    def _():
        c1_ref[...] = jnp.zeros_like(c1_ref)
        c2_ref[...] = jnp.zeros_like(c2_ref)
        c3_ref[...] = jnp.zeros_like(c3_ref)

    tn = x1_ref.shape[1]
    if needs_mask:
        # last tile may be partial: zero its out-of-range rows before K^T V
        row = n * tn + lax.broadcasted_iota(jnp.int32, (tn, 1), 0)
        valid = row < n_tokens
    else:
        valid = None

    def accum(tok, wkv_ref, c_ref):
        # fused [K | V] projection: one lane-dense (tn, *) @ (*, 2d) matmul
        kv = jnp.dot(tok, wkv_ref[...], preferred_element_type=f32)
        k, v = kv[:, :d], kv[:, d:]
        if valid is not None:
            k = jnp.where(valid, k, 0.0)
        k = k.astype(tok.dtype)
        v = v.astype(tok.dtype)
        # Full (d, d) K^T V; per-head blocks live on the diagonal.  One MXU
        # tile for d <= 128 (v5e) / 256 (v6e, v7x).
        # TODO(synk): for larger d, switch to a per-head batched dot_general to
        # avoid the num_heads x extra MXU FLOPs of the block-diagonal trick.
        c_ref[0] = c_ref[0] + lax.dot_general(
            k, v, (((0,), (0,)), ((), ())), preferred_element_type=f32)

    def u_proj(x_ref, wu_ref, bu_ref):
        x = x_ref[0]
        h = jnp.dot(x, wu_ref[...], preferred_element_type=f32) + bu_ref[...]
        return jnp.maximum(h, 0.0).astype(x.dtype)

    # one path at a time to keep peak liveness low
    accum(u_proj(x1_ref, wu1_ref, bu1_ref), wkv1_ref, c1_ref)
    accum(u_proj(x2_ref, wu2_ref, bu2_ref), wkv2_ref, c2_ref)
    accum(x3_ref[0], wkv3_ref, c3_ref)


# ---------------------------------------------------------------------------
# Phase 2: per-batch context softmax + weight fold (once), then stream token
# tiles: fused channel projection, folded end projection, residual, LayerNorm.
# ---------------------------------------------------------------------------
def _apply_kernel(c1_ref, c2_ref, c3_ref, x1_ref, x2_ref,
                  wcp1_ref, bcp1_ref, wcp2_ref, bcp2_ref,
                  wep1_ref, bep1_ref, wep2_ref, bep2_ref,
                  g1_ref, b1_ref, g2_ref, b2_ref,
                  o1_ref, o2_ref,
                  wmod1_sc, wmod2_sc,
                  *, d, num_heads, scale, eps):
    f32 = jnp.float32
    n = pl.program_id(1)

    @pl.when(n == 0)
    def _():
        # tiny (d, d) work, done once per batch element (n == 0), all in f32
        hd = d // num_heads
        di = lax.broadcasted_iota(jnp.int32, (d, d), 0) // hd
        ei = lax.broadcasted_iota(jnp.int32, (d, d), 1) // hd
        mask = di == ei

        def head_softmax(raw):
            # per-head softmax over dim=-2 of each (hd, hd) diagonal block
            logits = jnp.where(mask, raw * scale, -1e30)
            m = jnp.max(logits, axis=0, keepdims=True)
            e = jnp.where(mask, jnp.exp(logits - m), 0.0)
            return e / jnp.sum(e, axis=0, keepdims=True)

        s1 = head_softmax(c1_ref[0])
        s2 = head_softmax(c2_ref[0])
        s3 = head_softmax(c3_ref[0])

        # fold ctx into the end projection:
        #   [y | u @ ctx] @ Wep  ==  [y | u] @ [[Wep_y], [ctx @ Wep_a]]
        wmod1_sc[0:d, :] = wep1_ref[0:d, :].astype(f32)
        wmod1_sc[d:2 * d, :] = jnp.dot(
            s2 + s3, wep1_ref[d:2 * d, :].astype(f32), preferred_element_type=f32)
        wmod2_sc[0:d, :] = wep2_ref[0:d, :].astype(f32)
        wmod2_sc[d:2 * d, :] = jnp.dot(
            s1 + s3, wep2_ref[d:2 * d, :].astype(f32), preferred_element_type=f32)

    def path(x_ref, wcp_ref, bcp_ref, wmod_sc, bep_ref, g_ref, b_ref, o_ref):
        x = x_ref[0]
        cdt = x.dtype                               # keep MXU operands in input dtype
        # fused channel projection [y | u] (single wide matmul) + ReLU
        h = jnp.dot(x, wcp_ref[...], preferred_element_type=f32) + bcp_ref[...]
        h = jnp.maximum(h, 0.0).astype(cdt)
        # folded end projection + residual (f32)
        z = (x.astype(f32)
             + jnp.dot(h, wmod_sc[...].astype(cdt), preferred_element_type=f32)
             + bep_ref[...])
        # LayerNorm with f32 statistics
        mu = jnp.mean(z, axis=-1, keepdims=True)
        var = jnp.mean(jnp.square(z - mu), axis=-1, keepdims=True)
        o_ref[0] = ((z - mu) * lax.rsqrt(var + eps) * g_ref[...]
                    + b_ref[...]).astype(o_ref.dtype)

    # finish path 1 end-to-end before touching path 2 (halves peak liveness)
    path(x1_ref, wcp1_ref, bcp1_ref, wmod1_sc, bep1_ref, g1_ref, b1_ref, o1_ref)
    path(x2_ref, wcp2_ref, bcp2_ref, wmod2_sc, bep2_ref, g2_ref, b2_ref, o2_ref)


# ---------------------------------------------------------------------------
# Wrapper
# ---------------------------------------------------------------------------
def _pick_tn(n_tokens, max_width, itemsize=4, budget_bytes=16 << 20):
    """Token-tile size bounding per-step VMEM (double-buffered IO + f32 temps).
    Lower budget_bytes when targeting v7x's 64 MiB physical VMEM."""
    per_row = 24 * max_width * itemsize
    tn = int(min(n_tokens, max(8, budget_bytes // per_row), 2048))
    if tn < n_tokens:
        tn = max(8, (tn // 8) * 8)          # sublane-aligned when actually tiling
    return tn


def feature_fusion_moam(x1, x2, segfeature, params, num_heads=8):
    B, C, H, W = x1.shape
    Cs = segfeature.shape[1]
    N = H * W
    p = params
    d = p["wu1"].shape[1]
    assert d % num_heads == 0

    to_tok = lambda t: t.reshape(B, t.shape[1], N).transpose(0, 2, 1)
    t1, t2, t3 = to_tok(x1), to_tok(x2), to_tok(segfeature)

    # ---- fused weights: wider, lane-dense matmuls; fewer weight DMAs -------
    wcp1 = jnp.concatenate([p["wy1"], p["wu1"]], axis=1)      # (C, 2d)
    bcp1 = jnp.concatenate([p["by1"], p["bu1"]], axis=1)      # (1, 2d)
    wcp2 = jnp.concatenate([p["wy2"], p["wu2"]], axis=1)
    bcp2 = jnp.concatenate([p["by2"], p["bu2"]], axis=1)
    wkv1 = jnp.concatenate([p["wk1"], p["wv1"]], axis=1)      # (d, 2d)
    wkv2 = jnp.concatenate([p["wk2"], p["wv2"]], axis=1)
    wkv3 = jnp.concatenate([p["wk3"], p["wv3"]], axis=1)      # (Cs, 2d)
    wep1 = jnp.concatenate([p["wepy1"], p["wepa1"]], axis=0)  # (2d, C)
    wep2 = jnp.concatenate([p["wepy2"], p["wepa2"]], axis=0)

    ctx_weights = (p["wu1"], p["bu1"], p["wu2"], p["bu2"], wkv1, wkv2, wkv3)
    apply_weights = (wcp1, bcp1, wcp2, bcp2, wep1, p["bep1"], wep2, p["bep2"],
                     p["g1"], p["b1"], p["g2"], p["b2"])

    # ---- token-axis tiling + VMEM budget ------------------------------------
    max_width = max(C, Cs, 2 * d)
    tn = _pick_tn(N, max_width)
    nt = pl.cdiv(N, tn)
    needs_mask = (nt * tn != N)

    act_bytes = 24 * tn * max_width * 4
    w_bytes = 2 * sum(int(w.size) * w.dtype.itemsize
                      for w in ctx_weights + apply_weights)
    vmem_limit = int(min(48 << 20,
                         max(16 << 20, act_bytes + w_bytes + 16 * d * d * 4 + (2 << 20))))

    tok_spec = lambda c: pl.BlockSpec((1, tn, c), lambda b, n: (b, n, 0))
    ctx_spec = pl.BlockSpec((1, d, d), lambda b, n: (b, 0, 0))
    w_spec = lambda w: pl.BlockSpec(w.shape, lambda b, n: (0,) * w.ndim)
    cparams = pltpu.CompilerParams(
        dimension_semantics=("parallel", "arbitrary"),
        vmem_limit_bytes=vmem_limit)

    # ---- phase 1: accumulate raw contexts over token tiles ------------------
    ctx_kernel = functools.partial(_ctx_kernel, d=d, n_tokens=N,
                                   needs_mask=needs_mask)
    c1, c2, c3 = pl.pallas_call(
        ctx_kernel,
        out_shape=tuple(jax.ShapeDtypeStruct((B, d, d), jnp.float32)
                        for _ in range(3)),
        grid=(B, nt),
        in_specs=[tok_spec(C), tok_spec(C), tok_spec(Cs)]
                 + [w_spec(w) for w in ctx_weights],
        out_specs=(ctx_spec, ctx_spec, ctx_spec),
        compiler_params=cparams,
    )(t1, t2, t3, *ctx_weights)

    # ---- phase 2: softmax + fold once per batch, stream token tiles ---------
    scale = float(d // num_heads) ** -0.5
    apply_kernel = functools.partial(_apply_kernel, d=d, num_heads=num_heads,
                                     scale=scale, eps=1e-5)
    o1, o2 = pl.pallas_call(
        apply_kernel,
        out_shape=(jax.ShapeDtypeStruct((B, N, C), x1.dtype),
                   jax.ShapeDtypeStruct((B, N, C), x2.dtype)),
        grid=(B, nt),
        in_specs=[ctx_spec, ctx_spec, ctx_spec, tok_spec(C), tok_spec(C)]
                 + [w_spec(w) for w in apply_weights],
        out_specs=(tok_spec(C), tok_spec(C)),
        scratch_shapes=[pltpu.VMEM((2 * d, C), jnp.float32),
                        pltpu.VMEM((2 * d, C), jnp.float32)],
        compiler_params=cparams,
    )(c1, c2, c3, t1, t2, *apply_weights)

    to_nchw = lambda t: t.reshape(B, H, W, C).transpose(0, 3, 1, 2)
    return to_nchw(o1), to_nchw(o2)


# ---------------------------------------------------------------------------
# Parameters (trunc_normal 0.02 / zero bias / LN gamma=1 beta=0) + reference
# ---------------------------------------------------------------------------
def init_params(key, dim, num_heads=8, reduction=1):
    d = dim // reduction
    std = 0.02
    ks = jax.random.split(key, 16)

    def tn(k, shape):
        return std * jax.random.truncated_normal(k, -2.0, 2.0, shape, jnp.float32)

    zeros = lambda n: jnp.zeros((1, n), jnp.float32)
    ones = lambda n: jnp.ones((1, n), jnp.float32)
    return dict(
        wy1=tn(ks[0], (dim, d)), by1=zeros(d),
        wu1=tn(ks[1], (dim, d)), bu1=zeros(d),
        wy2=tn(ks[2], (dim, d)), by2=zeros(d),
        wu2=tn(ks[3], (dim, d)), bu2=zeros(d),
        wk1=tn(ks[4], (d, d)), wv1=tn(ks[5], (d, d)),
        wk2=tn(ks[6], (d, d)), wv2=tn(ks[7], (d, d)),
        wk3=tn(ks[8], (dim, d)), wv3=tn(ks[9], (dim, d)),
        wepy1=tn(ks[10], (d, dim)), wepa1=tn(ks[11], (d, dim)), bep1=zeros(dim),
        wepy2=tn(ks[12], (d, dim)), wepa2=tn(ks[13], (d, dim)), bep2=zeros(dim),
        g1=ones(dim), b1=zeros(dim), g2=ones(dim), b2=zeros(dim),
    )


def _reference(x1, x2, seg, params, num_heads=8):
    """Pure-JAX reference of the same reconstructed forward pass."""
    B, C, H, W = x1.shape
    N = H * W
    tok = lambda t: t.reshape(B, t.shape[1], N).transpose(0, 2, 1)
    t1, t2, t3 = tok(x1), tok(x2), tok(seg)
    p = params
    relu = jax.nn.relu
    y1 = relu(t1 @ p["wy1"] + p["by1"]); u1 = relu(t1 @ p["wu1"] + p["bu1"])
    y2 = relu(t2 @ p["wy2"] + p["by2"]); u2 = relu(t2 @ p["wu2"] + p["bu2"])
    d = p["wu1"].shape[1]
    hd = d // num_heads

    def heads(t):
        return t.reshape(B, N, num_heads, hd)

    def ctx(k, v):
        c = jnp.einsum("bnhd,bnhe->bhde", heads(k), heads(v)) * (hd ** -0.5)
        return jax.nn.softmax(c, axis=-2)

    c1 = ctx(u1 @ p["wk1"], u1 @ p["wv1"])
    c2 = ctx(u2 @ p["wk2"], u2 @ p["wv2"])
    c3 = ctx(t3 @ p["wk3"], t3 @ p["wv3"])
    a1 = jnp.einsum("bnhd,bhde->bnhe", heads(u1), c2 + c3).reshape(B, N, d)
    a2 = jnp.einsum("bnhd,bhde->bnhe", heads(u2), c1 + c3).reshape(B, N, d)
    z1 = t1 + y1 @ p["wepy1"] + a1 @ p["wepa1"] + p["bep1"]
    z2 = t2 + y2 @ p["wepy2"] + a2 @ p["wepa2"] + p["bep2"]

    def ln(z, g, b):
        mu = z.mean(-1, keepdims=True)
        var = ((z - mu) ** 2).mean(-1, keepdims=True)
        return (z - mu) / jnp.sqrt(var + 1e-5) * g + b

    o1, o2 = ln(z1, p["g1"], p["b1"]), ln(z2, p["g2"], p["b2"])
    back = lambda t: t.reshape(B, H, W, C).transpose(0, 3, 1, 2)
    return back(o1), back(o2)


if __name__ == "__main__":
    key = jax.random.PRNGKey(0)
    k1, k2, k3, kp = jax.random.split(key, 4)
    B, dim, H, W = 2, 32, 8, 8
    num_heads = 8

    x1 = jax.random.normal(k1, (B, dim, H, W), jnp.float32)
    x2 = jax.random.normal(k2, (B, dim, H, W), jnp.float32)
    segfeature = jax.random.normal(k3, (B, dim, H, W), jnp.float32)
    params = init_params(kp, dim, num_heads=num_heads)

    o1, o2 = feature_fusion_moam(x1, x2, segfeature, params, num_heads=num_heads)
    jax.block_until_ready((o1, o2))

    r1, r2 = _reference(x1, x2, segfeature, params, num_heads=num_heads)
    assert o1.shape == (B, dim, H, W) and o2.shape == (B, dim, H, W)
    assert jnp.allclose(o1, r1, atol=1e-3, rtol=1e-3), float(jnp.max(jnp.abs(o1 - r1)))
    assert jnp.allclose(o2, r2, atol=1e-3, rtol=1e-3), float(jnp.max(jnp.abs(o2 - r2)))
    print("KERNEL_OK")
</pallas_src>

<mosaic_0001>
module attributes {stable_mosaic.version = 11 : i64} {
  func.func @_ctx_kernel(%arg0: i32, %arg1: i32, %arg2: memref<1x64x32xf32, #tpu.memory_space<vmem>>, %arg3: memref<1x64x32xf32, #tpu.memory_space<vmem>>, %arg4: memref<1x64x32xf32, #tpu.memory_space<vmem>>, %arg5: memref<32x32xf32, #tpu.memory_space<vmem>>, %arg6: memref<1x32xf32, #tpu.memory_space<vmem>>, %arg7: memref<32x32xf32, #tpu.memory_space<vmem>>, %arg8: memref<1x32xf32, #tpu.memory_space<vmem>>, %arg9: memref<32x64xf32, #tpu.memory_space<vmem>>, %arg10: memref<32x64xf32, #tpu.memory_space<vmem>>, %arg11: memref<32x64xf32, #tpu.memory_space<vmem>>, %arg12: memref<1x32x32xf32, #tpu.memory_space<vmem>>, %arg13: memref<1x32x32xf32, #tpu.memory_space<vmem>>, %arg14: memref<1x32x32xf32, #tpu.memory_space<vmem>>) attributes {dimension_semantics = [#tpu.dimension_semantics<parallel>, #tpu.dimension_semantics<arbitrary>], iteration_bounds = array<i64: 2, 1>, scalar_prefetch = 0 : i64, scratch_operands = 0 : i64, tpu.core_type = #tpu.core_type<tc>, window_params = [{transform_indices = @transform_0, window_bounds = array<i64: 1, 64, 32>}, {transform_indices = @transform_1, window_bounds = array<i64: 1, 64, 32>}, {transform_indices = @transform_2, window_bounds = array<i64: 1, 64, 32>}, {pipeline_mode = #tpu.pipeline_mode<synchronous>, transform_indices = @transform_3, window_bounds = array<i64: 32, 32>}, {pipeline_mode = #tpu.pipeline_mode<synchronous>, transform_indices = @transform_4, window_bounds = array<i64: 1, 32>}, {pipeline_mode = #tpu.pipeline_mode<synchronous>, transform_indices = @transform_5, window_bounds = array<i64: 32, 32>}, {pipeline_mode = #tpu.pipeline_mode<synchronous>, transform_indices = @transform_6, window_bounds = array<i64: 1, 32>}, {pipeline_mode = #tpu.pipeline_mode<synchronous>, transform_indices = @transform_7, window_bounds = array<i64: 32, 64>}, {pipeline_mode = #tpu.pipeline_mode<synchronous>, transform_indices = @transform_8, window_bounds = array<i64: 32, 64>}, {pipeline_mode = #tpu.pipeline_mode<synchronous>, transform_indices = @transform_9, window_bounds = array<i64: 32, 64>}, {transform_indices = @transform_10, window_bounds = array<i64: 1, 32, 32>}, {transform_indices = @transform_11, window_bounds = array<i64: 1, 32, 32>}, {transform_indices = @transform_12, window_bounds = array<i64: 1, 32, 32>}]} {
    %c0_i32 = arith.constant 0 : i32
    %0 = arith.cmpi eq, %arg1, %c0_i32 : i32
    %1 = arith.extui %0 : i1 to i32
    %c0_i32_0 = arith.constant 0 : i32
    %2 = arith.cmpi ne, %1, %c0_i32_0 : i32
    scf.if %2 {
      %cst_50 = arith.constant 0.000000e+00 : f32
      %56 = vector.broadcast %cst_50 : f32 to vector<1x32x32xf32>
      %c0_51 = arith.constant 0 : index
      %c0_52 = arith.constant 0 : index
      %c0_53 = arith.constant 0 : index
      %57 = vector.load %arg12[%c0_51, %c0_52, %c0_53] : memref<1x32x32xf32, #tpu.memory_space<vmem>>, vector<1x32x32xf32>
      tpu.vector_store %arg12[%c0_51, %c0_52, %c0_53], %56 {strides = array<i32>} : memref<1x32x32xf32, #tpu.memory_space<vmem>>, vector<1x32x32xf32>,
      %cst_54 = arith.constant 0.000000e+00 : f32
      %58 = vector.broadcast %cst_54 : f32 to vector<1x32x32xf32>
      %c0_55 = arith.constant 0 : index
      %c0_56 = arith.constant 0 : index
      %c0_57 = arith.constant 0 : index
      %59 = vector.load %arg13[%c0_55, %c0_56, %c0_57] : memref<1x32x32xf32, #tpu.memory_space<vmem>>, vector<1x32x32xf32>
      tpu.vector_store %arg13[%c0_55, %c0_56, %c0_57], %58 {strides = array<i32>} : memref<1x32x32xf32, #tpu.memory_space<vmem>>, vector<1x32x32xf32>,
      %cst_58 = arith.constant 0.000000e+00 : f32
      %60 = vector.broadcast %cst_58 : f32 to vector<1x32x32xf32>
      %c0_59 = arith.constant 0 : index
      %c0_60 = arith.constant 0 : index
      %c0_61 = arith.constant 0 : index
      %61 = vector.load %arg14[%c0_59, %c0_60, %c0_61] : memref<1x32x32xf32, #tpu.memory_space<vmem>>, vector<1x32x32xf32>
      tpu.vector_store %arg14[%c0_59, %c0_60, %c0_61], %60 {strides = array<i32>} : memref<1x32x32xf32, #tpu.memory_space<vmem>>, vector<1x32x32xf32>,
    } else {
    }
    %c0 = arith.constant 0 : index
    %c0_1 = arith.constant 0 : index
    %c0_2 = arith.constant 0 : index
    %3 = vector.load %arg2[%c0, %c0_1, %c0_2] : memref<1x64x32xf32, #tpu.memory_space<vmem>>, vector<1x64x32xf32>
    %4 = vector.shape_cast %3 : vector<1x64x32xf32> to vector<64x32xf32>
    %c0_3 = arith.constant 0 : index
    %c0_4 = arith.constant 0 : index
    %5 = vector.load %arg5[%c0_3, %c0_4] : memref<32x32xf32, #tpu.memory_space<vmem>>, vector<32x32xf32>
    %cst = arith.constant dense<0.000000e+00> : vector<64x32xf32>
    %6 = tpu.matmul %4, %5, %cst {dimension_numbers = #tpu.dot_dimension_numbers<[1], [0], [0], [1], [0, 0, 1, 1], [], []>} : vector<64x32xf32>, vector<32x32xf32>, vector<64x32xf32> -> vector<64x32xf32>
    %c0_5 = arith.constant 0 : index
    %c0_6 = arith.constant 0 : index
    %7 = vector.load %arg6[%c0_5, %c0_6] : memref<1x32xf32, #tpu.memory_space<vmem>>, vector<1x32xf32>
    %8 = vector.broadcast %7 : vector<1x32xf32> to vector<64x32xf32>
    %9 = arith.addf %6, %8 : vector<64x32xf32>
    %cst_7 = arith.constant 0.000000e+00 : f32
    %10 = vector.broadcast %cst_7 : f32 to vector<64x32xf32>
    %11 = arith.maximumf %9, %10 : vector<64x32xf32>
    %c0_8 = arith.constant 0 : index
    %c0_9 = arith.constant 0 : index
    %12 = vector.load %arg9[%c0_8, %c0_9] : memref<32x64xf32, #tpu.memory_space<vmem>>, vector<32x64xf32>
    %cst_10 = arith.constant dense<0.000000e+00> : vector<64x64xf32>
    %13 = tpu.matmul %11, %12, %cst_10 {dimension_numbers = #tpu.dot_dimension_numbers<[1], [0], [0], [1], [0, 0, 1, 1], [], []>} : vector<64x32xf32>, vector<32x64xf32>, vector<64x64xf32> -> vector<64x64xf32>
    %14 = vector.extract_strided_slice %13 {offsets = [0, 0], sizes = [64, 32], strides = [1, 1]} : vector<64x64xf32> to vector<64x32xf32>
    %15 = vector.extract_strided_slice %13 {offsets = [0, 32], sizes = [64, 32], strides = [1, 1]} : vector<64x64xf32> to vector<64x32xf32>
    %c0_11 = arith.constant 0 : index
    %c0_12 = arith.constant 0 : index
    %c0_13 = arith.constant 0 : index
    %16 = vector.load %arg12[%c0_11, %c0_12, %c0_13] : memref<1x32x32xf32, #tpu.memory_space<vmem>>, vector<1x32x32xf32>
    %17 = vector.shape_cast %16 : vector<1x32x32xf32> to vector<32x32xf32>
    %cst_14 = arith.constant dense<0.000000e+00> : vector<32x32xf32>
    %18 = tpu.matmul %14, %15, %cst_14 {dimension_numbers = #tpu.dot_dimension_numbers<[0], [0], [1], [1], [0, 1, 1, 1], [], []>} : vector<64x32xf32>, vector<64x32xf32>, vector<32x32xf32> -> vector<32x32xf32>
    %19 = arith.addf %17, %18 : vector<32x32xf32>
    %c0_15 = arith.constant 0 : index
    %c0_16 = arith.constant 0 : index
    %c0_17 = arith.constant 0 : index
    %20 = vector.load %arg12[%c0_15, %c0_16, %c0_17] : memref<1x32x32xf32, #tpu.memory_space<vmem>>, vector<1x32x32xf32>
    %21 = vector.shape_cast %20 : vector<1x32x32xf32> to vector<32x32xf32>
    %22 = vector.shape_cast %19 : vector<32x32xf32> to vector<1x32x32xf32>
    tpu.vector_store %arg12[%c0_15, %c0_16, %c0_17], %22 {strides = array<i32>} : memref<1x32x32xf32, #tpu.memory_space<vmem>>, vector<1x32x32xf32>,
    %c0_18 = arith.constant 0 : index
    %c0_19 = arith.constant 0 : index
    %c0_20 = arith.constant 0 : index
    %23 = vector.load %arg3[%c0_18, %c0_19, %c0_20] : memref<1x64x32xf32, #tpu.memory_space<vmem>>, vector<1x64x32xf32>
    %24 = vector.shape_cast %23 : vector<1x64x32xf32> to vector<64x32xf32>
    %c0_21 = arith.constant 0 : index
    %c0_22 = arith.constant 0 : index
    %25 = vector.load %arg7[%c0_21, %c0_22] : memref<32x32xf32, #tpu.memory_space<vmem>>, vector<32x32xf32>
    %cst_23 = arith.constant dense<0.000000e+00> : vector<64x32xf32>
    %26 = tpu.matmul %24, %25, %cst_23 {dimension_numbers = #tpu.dot_dimension_numbers<[1], [0], [0], [1], [0, 0, 1, 1], [], []>} : vector<64x32xf32>, vector<32x32xf32>, vector<64x32xf32> -> vector<64x32xf32>
    %c0_24 = arith.constant 0 : index
    %c0_25 = arith.constant 0 : index
    %27 = vector.load %arg8[%c0_24, %c0_25] : memref<1x32xf32, #tpu.memory_space<vmem>>, vector<1x32xf32>
    %28 = vector.broadcast %27 : vector<1x32xf32> to vector<64x32xf32>
    %29 = arith.addf %26, %28 : vector<64x32xf32>
    %cst_26 = arith.constant 0.000000e+00 : f32
    %30 = vector.broadcast %cst_26 : f32 to vector<64x32xf32>
    %31 = arith.maximumf %29, %30 : vector<64x32xf32>
    %c0_27 = arith.constant 0 : index
    %c0_28 = arith.constant 0 : index
    %32 = vector.load %arg10[%c0_27, %c0_28] : memref<32x64xf32, #tpu.memory_space<vmem>>, vector<32x64xf32>
    %cst_29 = arith.constant dense<0.000000e+00> : vector<64x64xf32>
    %33 = tpu.matmul %31, %32, %cst_29 {dimension_numbers = #tpu.dot_dimension_numbers<[1], [0], [0], [1], [0, 0, 1, 1], [], []>} : vector<64x32xf32>, vector<32x64xf32>, vector<64x64xf32> -> vector<64x64xf32>
    %34 = vector.extract_strided_slice %33 {offsets = [0, 0], sizes = [64, 32], strides = [1, 1]} : vector<64x64xf32> to vector<64x32xf32>
    %35 = vector.extract_strided_slice %33 {offsets = [0, 32], sizes = [64, 32], strides = [1, 1]} : vector<64x64xf32> to vector<64x32xf32>
    %c0_30 = arith.constant 0 : index
    %c0_31 = arith.constant 0 : index
    %c0_32 = arith.constant 0 : index
    %36 = vector.load %arg13[%c0_30, %c0_31, %c0_32] : memref<1x32x32xf32, #tpu.memory_space<vmem>>, vector<1x32x32xf32>
    %37 = vector.shape_cast %36 : vector<1x32x32xf32> to vector<32x32xf32>
    %cst_33 = arith.constant dense<0.000000e+00> : vector<32x32xf32>
    %38 = tpu.matmul %34, %35, %cst_33 {dimension_numbers = #tpu.dot_dimension_numbers<[0], [0], [1], [1], [0, 1, 1, 1], [], []>} : vector<64x32xf32>, vector<64x32xf32>, vector<32x32xf32> -> vector<32x32xf32>
    %39 = arith.addf %37, %38 : vector<32x32xf32>
    %c0_34 = arith.constant 0 : index
    %c0_35 = arith.constant 0 : index
    %c0_36 = arith.constant 0 : index
    %40 = vector.load %arg13[%c0_34, %c0_35, %c0_36] : memref<1x32x32xf32, #tpu.memory_space<vmem>>, vector<1x32x32xf32>
    %41 = vector.shape_cast %40 : vector<1x32x32xf32> to vector<32x32xf32>
    %42 = vector.shape_cast %39 : vector<32x32xf32> to vector<1x32x32xf32>
    tpu.vector_store %arg13[%c0_34, %c0_35, %c0_36], %42 {strides = array<i32>} : memref<1x32x32xf32, #tpu.memory_space<vmem>>, vector<1x32x32xf32>,
    %c0_37 = arith.constant 0 : index
    %c0_38 = arith.constant 0 : index
    %c0_39 = arith.constant 0 : index
    %43 = vector.load %arg4[%c0_37, %c0_38, %c0_39] : memref<1x64x32xf32, #tpu.memory_space<vmem>>, vector<1x64x32xf32>
    %44 = vector.shape_cast %43 : vector<1x64x32xf32> to vector<64x32xf32>
    %c0_40 = arith.constant 0 : index
    %c0_41 = arith.constant 0 : index
    %45 = vector.load %arg11[%c0_40, %c0_41] : memref<32x64xf32, #tpu.memory_space<vmem>>, vector<32x64xf32>
    %cst_42 = arith.constant dense<0.000000e+00> : vector<64x64xf32>
    %46 = tpu.matmul %44, %45, %cst_42 {dimension_numbers = #tpu.dot_dimension_numbers<[1], [0], [0], [1], [0, 0, 1, 1], [], []>} : vector<64x32xf32>, vector<32x64xf32>, vector<64x64xf32> -> vector<64x64xf32>
    %47 = vector.extract_strided_slice %46 {offsets = [0, 0], sizes = [64, 32], strides = [1, 1]} : vector<64x64xf32> to vector<64x32xf32>
    %48 = vector.extract_strided_slice %46 {offsets = [0, 32], sizes = [64, 32], strides = [1, 1]} : vector<64x64xf32> to vector<64x32xf32>
    %c0_43 = arith.constant 0 : index
    %c0_44 = arith.constant 0 : index
    %c0_45 = arith.constant 0 : index
    %49 = vector.load %arg14[%c0_43, %c0_44, %c0_45] : memref<1x32x32xf32, #tpu.memory_space<vmem>>, vector<1x32x32xf32>
    %50 = vector.shape_cast %49 : vector<1x32x32xf32> to vector<32x32xf32>
    %cst_46 = arith.constant dense<0.000000e+00> : vector<32x32xf32>
    %51 = tpu.matmul %47, %48, %cst_46 {dimension_numbers = #tpu.dot_dimension_numbers<[0], [0], [1], [1], [0, 1, 1, 1], [], []>} : vector<64x32xf32>, vector<64x32xf32>, vector<32x32xf32> -> vector<32x32xf32>
    %52 = arith.addf %50, %51 : vector<32x32xf32>
    %c0_47 = arith.constant 0 : index
    %c0_48 = arith.constant 0 : index
    %c0_49 = arith.constant 0 : index
    %53 = vector.load %arg14[%c0_47, %c0_48, %c0_49] : memref<1x32x32xf32, #tpu.memory_space<vmem>>, vector<1x32x32xf32>
    %54 = vector.shape_cast %53 : vector<1x32x32xf32> to vector<32x32xf32>
    %55 = vector.shape_cast %52 : vector<32x32xf32> to vector<1x32x32xf32>
    tpu.vector_store %arg14[%c0_47, %c0_48, %c0_49], %55 {strides = array<i32>} : memref<1x32x32xf32, #tpu.memory_space<vmem>>, vector<1x32x32xf32>,
    return
  }
  func.func @transform_0(%arg0: i32, %arg1: i32) -> (i32, i32, i32) {
    %c0_i32 = arith.constant 0 : i32
    %c0_i32_0 = arith.constant 0 : i32
    return %arg0, %arg1, %c0_i32 : i32, i32, i32
  }
  func.func @transform_1(%arg0: i32, %arg1: i32) -> (i32, i32, i32) {
    %c0_i32 = arith.constant 0 : i32
    %c0_i32_0 = arith.constant 0 : i32
    return %arg0, %arg1, %c0_i32 : i32, i32, i32
  }
  func.func @transform_2(%arg0: i32, %arg1: i32) -> (i32, i32, i32) {
    %c0_i32 = arith.constant 0 : i32
    %c0_i32_0 = arith.constant 0 : i32
    return %arg0, %arg1, %c0_i32 : i32, i32, i32
  }
  func.func @transform_3(%arg0: i32, %arg1: i32) -> (i32, i32) {
    %c0_i32 = arith.constant 0 : i32
    %c0_i32_0 = arith.constant 0 : i32
    %c0_i32_1 = arith.constant 0 : i32
    return %c0_i32, %c0_i32_0 : i32, i32
  }
  func.func @transform_4(%arg0: i32, %arg1: i32) -> (i32, i32) {
    %c0_i32 = arith.constant 0 : i32
    %c0_i32_0 = arith.constant 0 : i32
    %c0_i32_1 = arith.constant 0 : i32
    return %c0_i32, %c0_i32_0 : i32, i32
  }
  func.func @transform_5(%arg0: i32, %arg1: i32) -> (i32, i32) {
    %c0_i32 = arith.constant 0 : i32
    %c0_i32_0 = arith.constant 0 : i32
    %c0_i32_1 = arith.constant 0 : i32
    return %c0_i32, %c0_i32_0 : i32, i32
  }
  func.func @transform_6(%arg0: i32, %arg1: i32) -> (i32, i32) {
    %c0_i32 = arith.constant 0 : i32
    %c0_i32_0 = arith.constant 0 : i32
    %c0_i32_1 = arith.constant 0 : i32
    return %c0_i32, %c0_i32_0 : i32, i32
  }
  func.func @transform_7(%arg0: i32, %arg1: i32) -> (i32, i32) {
    %c0_i32 = arith.constant 0 : i32
    %c0_i32_0 = arith.constant 0 : i32
    %c0_i32_1 = arith.constant 0 : i32
    return %c0_i32, %c0_i32_0 : i32, i32
  }
  func.func @transform_8(%arg0: i32, %arg1: i32) -> (i32, i32) {
    %c0_i32 = arith.constant 0 : i32
    %c0_i32_0 = arith.constant 0 : i32
    %c0_i32_1 = arith.constant 0 : i32
    return %c0_i32, %c0_i32_0 : i32, i32
  }
  func.func @transform_9(%arg0: i32, %arg1: i32) -> (i32, i32) {
    %c0_i32 = arith.constant 0 : i32
    %c0_i32_0 = arith.constant 0 : i32
    %c0_i32_1 = arith.constant 0 : i32
    return %c0_i32, %c0_i32_0 : i32, i32
  }
  func.func @transform_10(%arg0: i32, %arg1: i32) -> (i32, i32, i32) {
    %c0_i32 = arith.constant 0 : i32
    %c0_i32_0 = arith.constant 0 : i32
    %c0_i32_1 = arith.constant 0 : i32
    return %arg0, %c0_i32, %c0_i32_0 : i32, i32, i32
  }
  func.func @transform_11(%arg0: i32, %arg1: i32) -> (i32, i32, i32) {
    %c0_i32 = arith.constant 0 : i32
    %c0_i32_0 = arith.constant 0 : i32
    %c0_i32_1 = arith.constant 0 : i32
    return %arg0, %c0_i32, %c0_i32_0 : i32, i32, i32
  }
  func.func @transform_12(%arg0: i32, %arg1: i32) -> (i32, i32, i32) {
    %c0_i32 = arith.constant 0 : i32
    %c0_i32_0 = arith.constant 0 : i32
    %c0_i32_1 = arith.constant 0 : i32
    return %arg0, %c0_i32, %c0_i32_0 : i32, i32, i32
  }
}

</mosaic_0001>

<bundles_post_ra>
// kernel: tpu_custom_call.1
= control target key start
LH: loop header
LB: loop body
LE: loop exit
PB: predicated region body
PF: predicated region fallthrough
CT: control target
= control target key end

     0   :  { %s3244_s0 = inlined_call_operand.vmem [shape: f32[2,64,32], index: 0, kind: input, shape index: {}]   ;;  %s3245_s1 = inlined_call_operand.vmem [shape: f32[2,64,32], index: 1, kind: input, shape index: {}]   ;;  %s3246_s2 = inlined_call_operand.vmem [shape: f32[2,64,32], index: 2, kind: input, shape index: {}]   ;;  %s3247_s3 = inlined_call_operand.vmem [shape: f32[32,32], index: 3, kind: input, shape index: {}]   ;;  %s3248_s4 = inlined_call_operand.vmem [shape: f32[1,32], index: 4, kind: input, shape index: {}]   ;;  %s3249_s5 = inlined_call_operand.vmem [shape: f32[32,32], index: 5, kind: input, shape index: {}]   ;;  %s3250_s6 = inlined_call_operand.vmem [shape: f32[1,32], index: 6, kind: input, shape index: {}]   ;;  %s3251_s7 = inlined_call_operand.vmem [shape: f32[32,64], index: 7, kind: input, shape index: {}]   ;;  %s3252_s8 = inlined_call_operand.vmem [shape: f32[32,64], index: 8, kind: input, shape index: {}]   ;;  %s3253_s9 = inlined_call_operand.vmem [shape: f32[32,64], index: 9, kind: input, shape index: {}]   ;;  %s3254_s10 = inlined_call_operand.hbm [shape: f32[2,32,32], index: 10, kind: output, shape index: {0}]   ;;  %s3255_s11 = inlined_call_operand.hbm [shape: f32[2,32,32], index: 11, kind: output, shape index: {1}]   ;;  %s3256_s12 = inlined_call_operand.hbm [shape: f32[2,32,32], index: 12, kind: output, shape index: {2}]  }
   0x1   :  { %3266 = sst [smem:[#allocation11_spill]] %s3244_s0 }
   0x2   :  { %3267 = sst [smem:[#allocation12_spill]] %s3245_s1 }
   0x3   :  { %3268 = sst [smem:[#allocation13_spill]] %s3247_s3 }
   0x4   :  { %18 = vsyncpa [#allocation3], 0 }
   0x5   :  { %20 = vsyncpa [#allocation3 + $0x1], 0 }
   0x6   :  { %21 = vsyncpa [#allocation5], 0 }
   0x7   :  { %23 = vsyncpa [#allocation5 + $0x1], 0  ;;  %s2792_s21 = smov 0   ;;  %s2794_s22 = smov 0  }
   0x8   :  { %s2796_s23 = smov 0   ;;  %s2798_s24 = smov 0  }
   0x9   :  { %s2800_s25 = smov 0   ;;  %s2802_s26 = smov 0  }
   0xa LB: > { %3269 = sst [smem:[#allocation9_spill]] %s2714_s25  ;;  %s3258_s27 = sadd.s32 4294967295, %s2718_s26   ;;  %s2718_s26 = sphi %s2802_s26, %s29_s26   ;;  %s2714_s25 = sphi %s2800_s25, %s3284_s25   ;;  %s2710_s24 = sphi %s2798_s24, %s3283_s24   ;;  %s2706_s23 = sphi %s2796_s23, %s3287_s23   ;;  %s2702_s22 = sphi %s2794_s22, %s3286_s22   ;;  %s2698_s21 = sphi %s2792_s21, %s3285_s21  }
   0xb   : > { %s3257_s28 = sadd.s32 4294967294, %s2718_s26   ;;  %s41_s29 = sadd.s32 1, %s2714_s25 }
   0xc   : > { %s279_s30 = sadd.s32 1, %s2706_s23  ;;  %p43_p0 = scmp.ge.s32.totalorder %s41_s29, 2 }
   0xd   : > { %p289_p1 = scmp.ne.s32.totalorder %s2706_s23, %s2702_s22  ;;  %p290_p2 = scmp.eq.s32.totalorder %s3258_s27, 1 }
   0xe   : > { %p295_p3 = scmp.ne.s32.totalorder %s2702_s22, %s2698_s21  ;;  %s3289_s29 = smov (%p43_p0, %s41_s29), 0 }
   0xf   : > { %3270 = sst [smem:[#allocation10_spill]] %s3289_s29  ;;  %p2834_p4 = por %p290_p2, %p289_p1 }
  0x10   : > { %p296_p5 = scmp.eq.s32.totalorder %s3257_s28, 1  ;;  %s276_s14 = ssub.s32 %s2714_s25, %s3289_s29 }
  0x11   : > { %p2020_p6 = scmp.ge.s32.totalorder %s2718_s26, 1  ;;  %p277_p7 = scmp.eq.s32.totalorder %s276_s14, 0 }
  0x12   : > { %p2843_p8 = por %p296_p5, %p295_p3  ;;  %p426_p9 = scmp.lt.s32.totalorder %s2718_s26, 3 }
  0x13   : > { %s2849_s16 = scalar_select %p277_p7, %s2706_s23, %s279_s30  }
  0x14   : > { %p427_p10 = pnand %p2020_p6, %p426_p9 }
  0x15   : > { %s3273_s3 = sld [smem:[#allocation13_spill]] (!%p427_p10)  ;;  %p501_p11 = scmp.lt.s32.totalorder (!%p427_p10), %s2710_s24, 1  ;;  %v704_v5 = vld [vmem:[%s3251_s7] sm:$0xff] (!%p427_p10)  ;;  %v705_v6 = vld [vmem:[%s3251_s7 + $0x8] sm:$0xff] (!%p427_p10)  ;;  %vm534_vm0 = vcmask (!%p427_p10), 261120   ;;  %v706_v17 = vld [vmem:[%s3251_s7 + $0x10] sm:$0xff] (!%p427_p10) }
  0x16   : > { %430 = sbr.rel (%p427_p10) target bundleno = 1329 (0x531), region = 60  ;;  %v2371_v8 = vpack.c.bf16 (!%p427_p10), %v705_v6, %v704_v5  ;;  %s3274_s0 = sld [smem:[#allocation11_spill]] (!%p427_p10)  ;;  %v707_v18 = vld [vmem:[%s3251_s7 + $0x18] sm:$0xff] (!%p427_p10)  ;;  %v1019_v20 = vld [vmem:[%s3249_s5] sm:$0xff] (!%p427_p10)  ;;  %v1020_v21 = vld [vmem:[%s3249_s5 + $0x8] sm:$0xff] (!%p427_p10)  ;;  %vm905_vm1 = vcmask (!%p427_p10), 523264  }
  0x17   : > { %v2375_v19 = vpack.c.bf16 (!%p427_p10), %v707_v18, %v706_v17  ;;  %v2395_v22 = vpack.c.bf16 (!%p427_p10), %v1020_v21, %v1019_v20  ;;  %v2030_v23 = vld [vmem:[%s3248_s4] ss:$0 sm:$0xff] (!%p427_p10)  ;;  %v1021_v28 = vld [vmem:[%s3249_s5 + $0x10] sm:$0xff] (!%p427_p10)  ;;  %v1022_v29 = vld [vmem:[%s3249_s5 + $0x18] sm:$0xff] (!%p427_p10)  ;;  %s3275_s1 = sld [smem:[#allocation12_spill]] (!%p427_p10)  ;;  %s3261_s29 = sand.u32 (!%p427_p10), 1, %s2702_s22  }
  0x18   : > { %2372 = vmatprep.subr.bf16.mxu1 (!%p427_p10), %v2371_v8  ;;  %v2399_v35 = vpack.c.bf16 (!%p427_p10), %v1022_v29, %v1021_v28  ;;  %s2947_s14 = sshll.u32 (!%p427_p10), %s3261_s29, 5  ;;  %v1167_v29 = vld [vmem:[%s3252_s8] sm:$0xff] (!%p427_p10)  ;;  %s3081_s27 = sshll.u32 (!%p427_p10), %s2710_s24, 9 }
  0x19   : > { %2374 = vmatpush3.bf16.msra.mxu1 (!%p427_p10), %v2371_v8  ;;  %s2950_s30 = scalar_lea.vmem (!%p427_p10), [#allocation2], %s2947_s14  ;;  %s3043_s18 = scalar_lea.vmem (!%p427_p10), [#allocation4], %s2947_s14 }
  0x1a   : > { %2376 = vmatprep.subr.bf16.mxu1 (!%p427_p10), %v2375_v19 }
  0x1b   : > { %v555_v0 = vld [vmem:[%s3273_s3] sm:$0xff] (!%p427_p10)  ;;  %v556_v1 = vld [vmem:[%s3273_s3 + $0x8] sm:$0xff] (!%p427_p10)  ;;  %v557_v2 = vld [vmem:[%s3273_s3 + $0x10] sm:$0xff] (!%p427_p10) }
  0x1c   : > { %v2363_v3 = vpack.c.bf16 (!%p427_p10), %v556_v1, %v555_v0  ;;  %v558_v4 = vld [vmem:[%s3273_s3 + $0x18] sm:$0xff] (!%p427_p10)  ;;  %s1811_s3 = sshll.u32 (!%p427_p10), %s2950_s30, 4  ;;  %s3090_s3 = int_to_ptr.vmem [resolvable:$true] %s1811_s3 }
  0x1d   : > { %v2367_v7 = vpack.c.bf16 %v558_v4, %v557_v2  ;;  %s502_s19 = scalar_select %p501_p11, %s2710_s24, 1  ;;  %2378 = vmatpush3.bf16.msra.mxu1 %v2375_v19 }
  0x1e   : > { %2364 = vmatprep.subr.bf16.mxu0 %v2363_v3  ;;  %2396 = vmatprep.subr.bf16.mxu1 %v2395_v22  ;;  %s2722_s24 = smov [#allocation2]  }
  0x1f   : > { %2366 = vmatpush3.bf16.msra.mxu0 %v2363_v3  ;;  %s2871_s28 = sshll.u32 %s502_s19, 6  ;;  %s3066_s19 = scalar_lea.vmem [#allocation6], %s2947_s14 }
  0x20   : > { %2368 = vmatprep.subr.bf16.mxu0 %v2367_v7  ;;  %s508_s25 = scalar_lea.vmem %s3274_s0, %s2871_s28  ;;  %s518_s20 = scalar_lea.vmem %s3275_s1, %s2871_s28 }
  0x21   : > { %v547_v9 = vld [vmem:[%s508_s25] sm:$0xff]  ;;  %v548_v10 = vld [vmem:[%s508_s25 + $0x8] sm:$0xff]  ;;  %v549_v11 = vld [vmem:[%s508_s25 + $0x10] sm:$0xff]  ;;  %s528_s17 = scalar_lea.vmem %s3246_s2, %s2871_s28  ;;  %s3276_s28 = smov 96  }
  0x22   : > { %2205 = vmatprep.mubr.msk.f32.mxu0 %vm534_vm0, %v547_v9  ;;  %v550_v12 = vld [vmem:[%s508_s25 + $0x18] sm:$0xff]  ;;  %v551_v13 = vld [vmem:[%s508_s25 + $0x20] sm:$0xff]  ;;  %v552_v14 = vld [vmem:[%s508_s25 + $0x28] sm:$0xff]  ;;  %s3087_s1 = scalar_lea.hbm %s3254_s10, %s3081_s27 }
  0x23   : > { %2370 = vmatpush3.bf16.msra.mxu0 %v2367_v7  ;;  %v553_v15 = vld [vmem:[%s508_s25 + $0x30] sm:$0xff]  ;;  %v554_v16 = vld [vmem:[%s508_s25 + $0x38] sm:$0xff]  ;;  %v1011_v51 = vld [vmem:[%s518_s20] sm:$0xff]  ;;  %s3262_s25 = smov 96  }
  0x24   : > { %v1012_v52 = vld [vmem:[%s518_s20 + $0x8] sm:$0xff]  ;;  %v1013_v53 = vld [vmem:[%s518_s20 + $0x10] sm:$0xff]  ;;  %v1014_v54 = vld [vmem:[%s518_s20 + $0x18] sm:$0xff] }
  0x25   : > { %v1015_v55 = vld [vmem:[%s518_s20 + $0x20] sm:$0xff]  ;;  %v1016_v56 = vld [vmem:[%s518_s20 + $0x28] sm:$0xff]  ;;  %v1017_v57 = vld [vmem:[%s518_s20 + $0x30] sm:$0xff] }
  0x26   : > { %2206 = vmatmul.mubr.msk.f32.vlgmr.msra.gmra.mrb[0].mxu0 %vm534_vm0, %v548_v10  ;;  %v1018_v58 = vld [vmem:[%s518_s20 + $0x38] sm:$0xff]  ;;  %s2580_s20 = scalar_lea.vmem %s3090_s3, 512 }
  0x27   : > { %2208 = vmatprep.mubr.msk.f32.mxu0 %vm534_vm0, %v549_v11  ;;  %p2581_p12 = scmp.ne.s32.totalorder %s3090_s3, %s2580_s20 }
  0x29   : > { %p2582_p13 = pnand %p2581_p12, %p2834_p4 }
  0x2a   : > { %2209 = vmatmul.mubr.msk.f32.gmra.mrb[2].mxu0 %vm534_vm0, %v550_v12 }
  0x2b   : > { %2211 = vmatprep.mubr.msk.f32.mxu0 %vm534_vm0, %v551_v13  ;;  %p2583_p0 = pneg %p2582_p13 }
  0x2e   : > { %2212 = vmatmul.mubr.msk.f32.gmra.mrb[4].mxu0 %vm534_vm0, %v552_v14 }
  0x2f   : > { %2214 = vmatprep.mubr.msk.f32.mxu0 %vm534_vm0, %v553_v15  ;;  %v2721_v15 = vmov 0.0  }
  0x30   : > { %536 = vst.msk [vmem:[%s2950_s30 + $0x8] sm:$0xff] %vm534_vm0, %v2721_v15  ;;  %535 = vst.msk [vmem:[%s2950_s30] sm:$0xff] %vm534_vm0, %v2721_v15 }
  0x31   : > { %537 = vst.msk [vmem:[%s2950_s30 + $0x10] sm:$0xff] %vm534_vm0, %v2721_v15  ;;  %538 = vst.msk [vmem:[%s2950_s30 + $0x18] sm:$0xff] %vm534_vm0, %v2721_v15 }
  0x32   : > { %2215 = vmatmul.mubr.msk.f32.gmra.mrb[6].mxu0 %vm534_vm0, %v554_v16  ;;  %540 = vst.msk [vmem:[%s3043_s18 + $0x8] sm:$0xff] %vm534_vm0, %v2721_v15  ;;  %539 = vst.msk [vmem:[%s3043_s18] sm:$0xff] %vm534_vm0, %v2721_v15 }
  0x33   : > { %541 = vst.msk [vmem:[%s3043_s18 + $0x10] sm:$0xff] %vm534_vm0, %v2721_v15  ;;  %542 = vst.msk [vmem:[%s3043_s18 + $0x18] sm:$0xff] %vm534_vm0, %v2721_v15 }
  0x34   : > { %544 = vst.msk [vmem:[%s3066_s19 + $0x8] sm:$0xff] %vm534_vm0, %v2721_v15  ;;  %543 = vst.msk [vmem:[%s3066_s19] sm:$0xff] %vm534_vm0, %v2721_v15 }
  0x35   : > { %545 = vst.msk [vmem:[%s3066_s19 + $0x10] sm:$0xff] %vm534_vm0, %v2721_v15  ;;  %546 = vst.msk [vmem:[%s3066_s19 + $0x18] sm:$0xff] %vm534_vm0, %v2721_v15 }
  0xf9   : > { %v2207_v24 = vpop.f32.mrb[0].mxu0 }
  0xfa   : > { %v663_v25 = vadd.f32 %v2207_v24, %v2030_v23  ;;  %v657_v26 = vpop.f32.mrb[1].mxu0 }
  0xfb   : > { %v658_v27 = vadd.f32 %v2030_v23, %v657_v26 }
  0xfc   : > { %v697_v32 = vmax.f32 %v663_v25, 0.0 }
  0xfd   : > { %v696_v30 = vmax.f32 %v658_v27, 0.0  ;;  %v2210_v31 = vpop.f32.mrb[2].mxu0 }
  0xfe   : > { %v673_v33 = vadd.f32 %v2210_v31, %v2030_v23  ;;  %v667_v34 = vpop.f32.mrb[3].mxu0 }
  0xff   : > { %v668_v36 = vadd.f32 %v2030_v23, %v667_v34  ;;  %2225 = vmatprep.mubr.msk.f32.mxu1 %vm534_vm0, %v696_v30  ;;  %v1168_v30 = vld [vmem:[%s3252_s8 + $0x8] sm:$0xff] }
 0x100   : > { %2226 = vmatmul.mubr.msk.f32.vlgmr.msra.gmra.mrb[0].mxu1 %vm534_vm0, %v697_v32  ;;  %v699_v39 = vmax.f32 %v673_v33, 0.0  ;;  %v2403_v34 = vpack.c.bf16 %v1168_v30, %v1167_v29 }
 0x101   : > { %v698_v37 = vmax.f32 %v668_v36, 0.0  ;;  %v2213_v38 = vpop.f32.mrb[4].mxu0  ;;  %2398 = vmatpush3.bf16.msra.mxu1 %v2395_v22  ;;  %v1169_v36 = vld [vmem:[%s3252_s8 + $0x10] sm:$0xff] }
 0x102   : > { %v683_v40 = vadd.f32 %v2213_v38, %v2030_v23  ;;  %v677_v41 = vpop.f32.mrb[5].mxu0  ;;  %2400 = vmatprep.subr.bf16.mxu1 %v2399_v35  ;;  %v2051_v38 = vld [vmem:[%s3250_s6] ss:$0 sm:$0xff] }
 0x103   : > { %2228 = vmatprep.mubr.msk.f32.mxu1 %vm534_vm0, %v698_v37  ;;  %v678_v42 = vadd.f32 %v2030_v23, %v677_v41  ;;  %v1170_v37 = vld [vmem:[%s3252_s8 + $0x18] sm:$0xff]  ;;  %v1481_v41 = vld [vmem:[%s3253_s9] sm:$0xff] }
 0x104   : > { %2229 = vmatmul.mubr.msk.f32.gmra.mrb[2].mxu1 %vm534_vm0, %v699_v39  ;;  %v701_v43 = vmax.f32 %v683_v40, 0.0  ;;  %v2407_v39 = vpack.c.bf16 %v1170_v37, %v1169_v36 }
 0x105   : > { %v700_v44 = vmax.f32 %v678_v42, 0.0  ;;  %v2216_v45 = vpop.f32.mrb[6].mxu0  ;;  %2402 = vmatpush3.bf16.msra.mxu1 %v2399_v35  ;;  %v1482_v42 = vld [vmem:[%s3253_s9 + $0x8] sm:$0xff] }
 0x106   : > { %v693_v46 = vadd.f32 %v2216_v45, %v2030_v23  ;;  %v687_v47 = vpop.f32.mrb[7].mxu0 }
 0x107   : > { %v688_v48 = vadd.f32 %v2030_v23, %v687_v47  ;;  %2231 = vmatprep.mubr.msk.f32.mxu1 %vm534_vm0, %v700_v44  ;;  %v2427_v44 = vpack.c.bf16 %v1482_v42, %v1481_v41 }
 0x108   : > { %v703_v49 = vmax.f32 %v693_v46, 0.0  ;;  %2232 = vmatmul.mubr.msk.f32.gmra.mrb[4].mxu1 %vm534_vm0, %v701_v43 }
 0x109   : > { %v702_v50 = vmax.f32 %v688_v48, 0.0 }
 0x10b   : > { %2234 = vmatprep.mubr.msk.f32.mxu1 %vm534_vm0, %v702_v50  ;;  %v1483_v50 = vld [vmem:[%s3253_s9 + $0x10] sm:$0xff] }
 0x10c   : > { %2235 = vmatmul.mubr.msk.f32.gmra.mrb[6].mxu1 %vm534_vm0, %v703_v49 }
 0x10d   : > { %2267 = vmatprep.mubr.msk.f32.mxu1 %vm534_vm0, %v1011_v51  ;;  %v1484_v51 = vld [vmem:[%s3253_s9 + $0x18] sm:$0xff] }
 0x110   : > { %2268 = vmatmul.mubr.msk.f32.vlgmr.msra.gmra.mrb[8].mxu1 %vm534_vm0, %v1012_v52 }
 0x111   : > { %2270 = vmatprep.mubr.msk.f32.mxu1 %vm534_vm0, %v1013_v53 }
 0x114   : > { %2271 = vmatmul.mubr.msk.f32.gmra.mrb[10].mxu1 %vm534_vm0, %v1014_v54 }
 0x115   : > { %2273 = vmatprep.mubr.msk.f32.mxu1 %vm534_vm0, %v1015_v55 }
 0x118   : > { %2274 = vmatmul.mubr.msk.f32.gmra.mrb[12].mxu1 %vm534_vm0, %v1016_v56  ;;  %v2431_v56 = vpack.c.bf16 %v1484_v51, %v1483_v50 }
 0x119   : > { %2276 = vmatprep.mubr.msk.f32.mxu1 %vm534_vm0, %v1017_v57 }
 0x11c   : > { %2277 = vmatmul.mubr.msk.f32.gmra.mrb[14].mxu1 %vm534_vm0, %v1018_v58 }
 0x1d3   : > { %v2227_v59 = vpop.f32.mrb[0].mxu1 }
 0x1d4   : > { %v798_v60 = vpop.f32.mrb[1].mxu1 }
 0x1d5   : > { %v2520_v61 = vpack.i.bf16 %v2227_v59, %v798_v60 }
 0x1d7   : > { %2521 = vrot.lane.b32.xlu0 %v2520_v61, %s3262_s25  ;;  %v2230_v62 = vpop.f32.mrb[2].mxu1 }
 0x1d8   : > { %v808_v63 = vpop.f32.mrb[3].mxu1 }
 0x1d9   : > { %v2525_v0 = vpack.i.bf16 %v2230_v62, %v808_v63 }
 0x1db   : > { %2526 = vrot.lane.b32.xlu0 %v2525_v0, %s3262_s25  ;;  %v2233_v1 = vpop.f32.mrb[4].mxu1 }
 0x1dc   : > { %v818_v2 = vpop.f32.mrb[5].mxu1 }
 0x1dd   : > { %v2530_v3 = vpack.i.bf16 %v2233_v1, %v818_v2 }
 0x1df   : > { %2531 = vrot.lane.b32.xlu1 %v2530_v3, %s3262_s25  ;;  %v2236_v4 = vpop.f32.mrb[6].mxu1  ;;  %v1475_v3 = vld [vmem:[%s528_s17 + $0x10] sm:$0xff] }
 0x1e0   : > { %v828_v5 = vpop.f32.mrb[7].mxu1 }
 0x1e1   : > { %v2535_v6 = vpack.i.bf16 %v2236_v4, %v828_v5 }
 0x1e3   : > { %2536 = vrot.lane.b32.xlu1 %v2535_v6, %s3262_s25  ;;  %v2930_v7 = vpop.f32.mrb[8].mxu1  ;;  %v1478_v6 = vld [vmem:[%s528_s17 + $0x28] sm:$0xff]  ;;  %s3277_s25 = sand.u32 1, %s2702_s22  }
 0x1e4   : > { %v1120_v8 = vpop.f32.mrb[9].mxu1  ;;  %v1126_v48 = vadd.f32 %v2930_v7, %v2051_v38  ;;  %v1479_v7 = vld [vmem:[%s528_s17 + $0x30] sm:$0xff]  ;;  %s3094_s29 = scalar_lea.sflag [#allocation3], %s3277_s25 }
 0x1e5   : > { %v1121_v43 = vadd.f32 %v2051_v38, %v1120_v8  ;;  %v1480_v8 = vld [vmem:[%s528_s17 + $0x38] sm:$0xff] }
 0x1e6   : > { %v1160_v54 = vmax.f32 %v1126_v48, 0.0 }
 0x1e7   : > { %v2932_v9 = vpop.f32.mrb[10].mxu1  ;;  %v1159_v46 = vmax.f32 %v1121_v43, 0.0 }
 0x1e8   : > { %v2934_v10 = vpop.f32.mrb[11].mxu1  ;;  %v1136_v55 = vadd.f32 %v2932_v9, %v2051_v38  ;;  %v838_v9 = vld [vmem:[%s2950_s30 + $0x8] sm:$0xff] }
 0x1e9   : > { %v1131_v47 = vadd.f32 %v2051_v38, %v2934_v10  ;;  %v837_v10 = vld [vmem:[%s2950_s30] sm:$0xff] }
 0x1eb   : > { %v2936_v11 = vpop.f32.mrb[12].mxu1  ;;  %v1161_v52 = vmax.f32 %v1131_v47, 0.0 }
 0x1ec   : > { %v2938_v12 = vpop.f32.mrb[13].mxu1 }
 0x1ed   : > { %v1141_v53 = vadd.f32 %v2051_v38, %v2938_v12 }
 0x1ef   : > { %v2940_v13 = vpop.f32.mrb[14].mxu1  ;;  %v1163_v57 = vmax.f32 %v1141_v53, 0.0 }
 0x1f0   : > { %v2942_v14 = vpop.f32.mrb[15].mxu1 }
 0x1f1   : > { %v1151_v58 = vadd.f32 %v2051_v38, %v2942_v14 }
 0x1f3   : > { %v1165_v61 = vmax.f32 %v1151_v58, 0.0 }
 0x1f9   : > { %841 = vxpose.xlu0.b32.start [1/8] (short) (narrow) %v798_v60, 32  ;;  %v1146_v60 = vadd.f32 %v2936_v11, %v2051_v38 }
 0x1fd   : > { %842 = vxpose.xlu0.b32.cont [2/8] (short) (narrow) %v2227_v59, 32  ;;  %v1162_v59 = vmax.f32 %v1136_v55, 0.0 }
 0x201   : > { %843 = vxpose.xlu0.b32.cont [3/8] (short) (narrow) %v808_v63, 32  ;;  %v1156_v63 = vadd.f32 %v2940_v13, %v2051_v38 }
 0x203   : > { %v1166_v0 = vmax.f32 %v1156_v63, 0.0 }
 0x205   : > { %844 = vxpose.xlu0.b32.cont [4/8] (short) (narrow) %v2230_v62, 32  ;;  %v1164_v62 = vmax.f32 %v1146_v60, 0.0 }
 0x209   : > { %845 = vxpose.xlu0.b32.cont [5/8] (short) (narrow) %v818_v2, 32  ;;  %v1474_v2 = vld [vmem:[%s528_s17 + $0x8] sm:$0xff] }
 0x20d   : > { %846 = vxpose.xlu0.b32.cont [6/8] (short) (narrow) %v2233_v1, 32  ;;  %v1473_v1 = vld [vmem:[%s528_s17] sm:$0xff] }
 0x211   : > { %847 = vxpose.xlu0.b32.cont [7/8] (short) (narrow) %v828_v5, 32  ;;  %v1477_v5 = vld [vmem:[%s528_s17 + $0x20] sm:$0xff] }
 0x215   : > { %848 = vxpose.xlu0.b32.end [8/8] (short) (narrow) %v2236_v4, 32  ;;  %v1476_v4 = vld [vmem:[%s528_s17 + $0x18] sm:$0xff]  ;;  %s2584_s17 = sshll.u32 %s2722_s24, 4  ;;  %s2585_s17 = int_to_ptr.vmem [resolvable:$false] %s2584_s17 }
 0x216   : > { %p2587_p1 = scmp.lt.s32.totalorder %s3090_s3, %s2585_s17 }
 0x249   : > { %v2522_v16 = vpop.permute.xlu0 %2521 }
 0x24a   : > { %v2524_v17 = vunpack.i.h.bf16 %v2522_v16  ;;  %v2523_v18 = vunpack.i.l.bf16 %v2522_v16  ;;  %v840_v16 = vld [vmem:[%s2950_s30 + $0x18] sm:$0xff] }
 0x24c   : > { %v2379_v19 = vpack.c.bf16 %v2524_v17, %v2523_v18  ;;  %v839_v17 = vld [vmem:[%s2950_s30 + $0x10] sm:$0xff] }
 0x24d   : > { %v2527_v20 = vpop.permute.xlu0 %2526 }
 0x24e   : > { %v2529_v21 = vunpack.i.h.bf16 %v2527_v20  ;;  %v2528_v22 = vunpack.i.l.bf16 %v2527_v20  ;;  %2380 = vmatprep.subr.bf16.mxu0 %v2379_v19 }
 0x24f   : > { %2382 = vmatpush3.bf16.msra.mxu0 %v2379_v19 }
 0x250   : > { %v2383_v23 = vpack.c.bf16 %v2529_v21, %v2528_v22 }
 0x251   : > { %v2532_v24 = vpop.permute.xlu1 %2531 }
 0x252   : > { %2384 = vmatprep.subr.bf16.mxu0 %v2383_v23  ;;  %v2534_v25 = vunpack.i.h.bf16 %v2532_v24  ;;  %v2533_v26 = vunpack.i.l.bf16 %v2532_v24 }
 0x253   : > { %2386 = vmatpush3.bf16.msra.mxu0 %v2383_v23 }
 0x254   : > { %v2387_v27 = vpack.c.bf16 %v2534_v25, %v2533_v26 }
 0x255   : > { %v2537_v28 = vpop.permute.xlu1 %2536 }
 0x256   : > { %v2539_v31 = vunpack.i.h.bf16 %v2537_v28  ;;  %v2538_v32 = vunpack.i.l.bf16 %v2537_v28  ;;  %2388 = vmatprep.subr.bf16.mxu0 %v2387_v27 }
 0x257   : > { %2390 = vmatpush3.bf16.msra.mxu0 %v2387_v27 }
 0x258   : > { %v2391_v33 = vpack.c.bf16 %v2539_v31, %v2538_v32 }
 0x25a   : > { %2392 = vmatprep.subr.bf16.mxu0 %v2391_v33 }
 0x25b   : > { %2394 = vmatpush3.bf16.msra.mxu0 %v2391_v33 }
 0x25c   : > { %2404 = vmatprep.subr.bf16.mxu0 %v2403_v34 }
 0x279   : > { %v857_v35 = vpop.trf.xlu0 }
 0x27a   : > { %2253 = vmatprep.mubr.msk.f32.mxu0 %vm905_vm1, %v857_v35 }
 0x27d   : > { %v858_v40 = vpop.trf.xlu0 }
 0x27e   : > { %2254 = vmatmul.mubr.msk.f32.vlgmr.msra.gmra.mrb[8].mxu0 %vm905_vm1, %v858_v40 }
 0x27f   : > { %2406 = vmatpush3.bf16.msra.mxu0 %v2403_v34 }
 0x280   : > { %2408 = vmatprep.subr.bf16.mxu0 %v2407_v39 }
 0x281   : > { %v859_v45 = vpop.trf.xlu0 }
 0x282   : > { %2256 = vmatprep.mubr.msk.f32.mxu0 %vm905_vm1, %v859_v45 }
 0x283   : > { %2410 = vmatpush3.bf16.msra.mxu0 %v2407_v39 }
 0x284   : > { %2428 = vmatprep.subr.bf16.mxu0 %v2427_v44 }
 0x285   : > { %v860_v49 = vpop.trf.xlu0 }
 0x286   : > { %2257 = vmatmul.mubr.msk.f32.gmra.mrb[10].mxu0 %vm905_vm1, %v860_v49 }
 0x287   : > { %2287 = vmatprep.mubr.msk.f32.mxu0 %vm534_vm0, %v1159_v46 }
 0x28a   : > { %2288 = vmatmul.mubr.msk.f32.vlgmr.msra.gmra.mrb[12].mxu0 %vm534_vm0, %v1160_v54 }
 0x28b   : > { %2430 = vmatpush3.bf16.msra.mxu0 %v2427_v44  ;;  %2290 = vmatprep.mubr.msk.f32.mxu0 %vm534_vm0, %v1161_v52 }
 0x28c   : > { %2432 = vmatprep.subr.bf16.mxu0 %v2431_v56 }
 0x28e   : > { %2291 = vmatmul.mubr.msk.f32.gmra.mrb[14].mxu0 %vm534_vm0, %v1162_v59 }
 0x28f   : > { %2293 = vmatprep.mubr.msk.f32.mxu0 %vm534_vm0, %v1163_v57  ;;  %2434 = vmatpush3.bf16.msra.mxu0 %v2431_v56 }
 0x292   : > { %2294 = vmatmul.mubr.msk.f32.gmra.mrb[16].mxu0 %vm534_vm0, %v1164_v62 }
 0x293   : > { %2296 = vmatprep.mubr.msk.f32.mxu0 %vm534_vm0, %v1165_v61 }
 0x296   : > { %2297 = vmatmul.mubr.msk.f32.gmra.mrb[18].mxu0 %vm534_vm0, %v1166_v0 }
 0x297   : > { %2329 = vmatprep.mubr.msk.f32.mxu0 %vm534_vm0, %v1473_v1 }
 0x29a   : > { %2330 = vmatmul.mubr.msk.f32.vlgmr.msra.gmra.mrb[20].mxu0 %vm534_vm0, %v1474_v2 }
 0x29b   : > { %2332 = vmatprep.mubr.msk.f32.mxu0 %vm534_vm0, %v1475_v3 }
 0x29e   : > { %2333 = vmatmul.mubr.msk.f32.gmra.mrb[22].mxu0 %vm534_vm0, %v1476_v4 }
 0x29f   : > { %2335 = vmatprep.mubr.msk.f32.mxu0 %vm534_vm0, %v1477_v5 }
 0x2a2   : > { %2336 = vmatmul.mubr.msk.f32.gmra.mrb[24].mxu0 %vm534_vm0, %v1478_v6 }
 0x2a3   : > { %2338 = vmatprep.mubr.msk.f32.mxu0 %vm534_vm0, %v1479_v7 }
 0x2a6   : > { %2339 = vmatmul.mubr.msk.f32.gmra.mrb[26].mxu0 %vm534_vm0, %v1480_v8 }
 0x351   : > { %v2255_v11 = vpop.f32.mrb[8].mxu0 }
 0x352   : > { %v1004_v12 = vadd.f32 %v2255_v11, %v838_v9  ;;  %v984_v13 = vpop.f32.mrb[9].mxu0 }
 0x353   : > { %v1003_v14 = vadd.f32 %v984_v13, %v837_v10 }
 0x354   : > { %1008 = vst.msk [vmem:[%s2950_s30 + $0x8] sm:$0xff] %vm534_vm0, %v1004_v12 }
 0x355   : > { %1007 = vst.msk [vmem:[%s2950_s30] sm:$0xff] %vm534_vm0, %v1003_v14 }
 0x359   : > { %v2258_v18 = vpop.f32.mrb[10].mxu0 }
 0x35a   : > { %v1006_v19 = vadd.f32 %v2258_v18, %v840_v16  ;;  %v994_v20 = vpop.f32.mrb[11].mxu0 }
 0x35b   : > { %v1005_v21 = vadd.f32 %v994_v20, %v839_v17 }
 0x35c   : > { %1010 = vst.msk [vmem:[%s2950_s30 + $0x18] sm:$0xff] %vm534_vm0, %v1006_v19 }
 0x35d   : > { %1009 = vst.msk [vmem:[%s2950_s30 + $0x10] sm:$0xff] %vm534_vm0, %v1005_v21  ;;  %v2289_v22 = vpop.f32.mrb[12].mxu0 }
 0x35e   : > { %v1261_v23 = vpop.f32.mrb[13].mxu0 }
 0x35f   : > { %v2540_v24 = vpack.i.bf16 %v2289_v22, %v1261_v23 }
 0x361   : > { %2541 = vrot.lane.b32.xlu1 %v2540_v24, %s3276_s28  ;;  %v2292_v25 = vpop.f32.mrb[14].mxu0 }
 0x362   : > { %v1271_v26 = vpop.f32.mrb[15].mxu0 }
 0x363   : > { %v2545_v27 = vpack.i.bf16 %v2292_v25, %v1271_v26 }
 0x365   : > { %2546 = vrot.lane.b32.xlu1 %v2545_v27, %s3276_s28  ;;  %v2295_v28 = vpop.f32.mrb[16].mxu0 }
 0x366   : > { %v1281_v29 = vpop.f32.mrb[17].mxu0 }
 0x367   : > { %v2550_v30 = vpack.i.bf16 %v2295_v28, %v1281_v29 }
 0x369   : > { %2551 = vrot.lane.b32.xlu1 %v2550_v30, %s3276_s28  ;;  %v2298_v31 = vpop.f32.mrb[18].mxu0 }
 0x36a   : > { %v1291_v32 = vpop.f32.mrb[19].mxu0 }
 0x36b   : > { %v2555_v33 = vpack.i.bf16 %v2298_v31, %v1291_v32 }
 0x36d   : > { %2556 = vrot.lane.b32.xlu1 %v2555_v33, %s3276_s28  ;;  %v2331_v34 = vpop.f32.mrb[20].mxu0 }
 0x36e   : > { %v1575_v35 = vpop.f32.mrb[21].mxu0 }
 0x36f   : > { %v2560_v36 = vpack.i.bf16 %v2331_v34, %v1575_v35  ;;  %1618 = vxpose.xlu0.b32.start [1/8] (short) (narrow) %v1575_v35, 32 }
 0x371   : > { %2561 = vrot.lane.b32.xlu1 %v2560_v36, %s3276_s28  ;;  %v2334_v37 = vpop.f32.mrb[22].mxu0 }
 0x372   : > { %v1585_v38 = vpop.f32.mrb[23].mxu0 }
 0x373   : > { %v2565_v39 = vpack.i.bf16 %v2334_v37, %v1585_v38  ;;  %1619 = vxpose.xlu0.b32.cont [2/8] (short) (narrow) %v2331_v34, 32 }
 0x375   : > { %2566 = vrot.lane.b32.xlu1 %v2565_v39, %s3276_s28  ;;  %v2337_v40 = vpop.f32.mrb[24].mxu0 }
 0x376   : > { %v1595_v41 = vpop.f32.mrb[25].mxu0 }
 0x377   : > { %v2570_v42 = vpack.i.bf16 %v2337_v40, %v1595_v41  ;;  %1620 = vxpose.xlu0.b32.cont [3/8] (short) (narrow) %v1585_v38, 32 }
 0x379   : > { %2571 = vrot.lane.b32.xlu1 %v2570_v42, %s3276_s28  ;;  %v2340_v43 = vpop.f32.mrb[26].mxu0 }
 0x37a   : > { %v1605_v44 = vpop.f32.mrb[27].mxu0 }
 0x37b   : > { %v2575_v45 = vpack.i.bf16 %v2340_v43, %v1605_v44  ;;  %1621 = vxpose.xlu0.b32.cont [4/8] (short) (narrow) %v2334_v37, 32 }
 0x37d   : > { %2576 = vrot.lane.b32.xlu1 %v2575_v45, %s3276_s28  ;;  %s2586_s28 = scalar_lea.vmem %s2585_s17, 1024 }
 0x37e   : > { %p2588_p2 = scmp.lt.s32.totalorder %s2586_s28, %s2580_s20 }
 0x37f   : > { %1622 = vxpose.xlu0.b32.cont [5/8] (short) (narrow) %v1595_v41, 32 }
 0x380   : > { %p2589_p3 = por %p2588_p2, %p2587_p1 }
 0x382   : > { %p2590_p5 = pnand %p2589_p3, %p2583_p0 }
 0x383   : > { %1623 = vxpose.xlu0.b32.cont [6/8] (short) (narrow) %v2337_v40, 32 }
 0x387   : > { %1624 = vxpose.xlu0.b32.cont [7/8] (short) (narrow) %v1605_v44, 32 }
 0x38b   : > { %1625 = vxpose.xlu0.b32.end [8/8] (short) (narrow) %v2340_v43, 32 }
 0x3a6   : > { %1304 = vxpose.xlu1.b32.start [1/8] (short) (narrow) %v1261_v23, 32 }
 0x3aa   : > { %1305 = vxpose.xlu1.b32.cont [2/8] (short) (narrow) %v2289_v22, 32 }
 0x3ae   : > { %1306 = vxpose.xlu1.b32.cont [3/8] (short) (narrow) %v1271_v26, 32 }
 0x3b2   : > { %1307 = vxpose.xlu1.b32.cont [4/8] (short) (narrow) %v2292_v25, 32 }
 0x3b6   : > { %1308 = vxpose.xlu1.b32.cont [5/8] (short) (narrow) %v1281_v29, 32 }
 0x3ba   : > { %1309 = vxpose.xlu1.b32.cont [6/8] (short) (narrow) %v2295_v28, 32 }
 0x3be   : > { %1310 = vxpose.xlu1.b32.cont [7/8] (short) (narrow) %v1291_v32, 32 }
 0x3c2   : > { %1311 = vxpose.xlu1.b32.end [8/8] (short) (narrow) %v2298_v31, 32 }
 0x3d3   : > { %v2542_v46 = vpop.permute.xlu1 %2541 }
 0x3d4   : > { %v2544_v47 = vunpack.i.h.bf16 %v2542_v46  ;;  %v2543_v48 = vunpack.i.l.bf16 %v2542_v46 }
 0x3d6   : > { %v2411_v49 = vpack.c.bf16 %v2544_v47, %v2543_v48 }
 0x3d7   : > { %v2547_v50 = vpop.permute.xlu1 %2546 }
 0x3d8   : > { %v2549_v51 = vunpack.i.h.bf16 %v2547_v50  ;;  %v2548_v52 = vunpack.i.l.bf16 %v2547_v50  ;;  %2412 = vmatprep.subr.bf16.mxu1 %v2411_v49 }
 0x3d9   : > { %2414 = vmatpush3.bf16.msra.mxu1 %v2411_v49 }
 0x3da   : > { %v2415_v53 = vpack.c.bf16 %v2549_v51, %v2548_v52 }
 0x3db   : > { %v2552_v54 = vpop.permute.xlu1 %2551 }
 0x3dc   : > { %v2554_v55 = vunpack.i.h.bf16 %v2552_v54  ;;  %v2553_v56 = vunpack.i.l.bf16 %v2552_v54  ;;  %2416 = vmatprep.subr.bf16.mxu1 %v2415_v53 }
 0x3dd   : > { %2418 = vmatpush3.bf16.msra.mxu1 %v2415_v53 }
 0x3de   : > { %v2419_v57 = vpack.c.bf16 %v2554_v55, %v2553_v56 }
 0x3df   : > { %v2557_v58 = vpop.permute.xlu1 %2556 }
 0x3e0   : > { %v2559_v59 = vunpack.i.h.bf16 %v2557_v58  ;;  %v2558_v60 = vunpack.i.l.bf16 %v2557_v58  ;;  %2420 = vmatprep.subr.bf16.mxu1 %v2419_v57 }
 0x3e1   : > { %2422 = vmatpush3.bf16.msra.mxu1 %v2419_v57 }
 0x3e2   : > { %v2423_v61 = vpack.c.bf16 %v2559_v59, %v2558_v60 }
 0x3e3   : > { %v2562_v62 = vpop.permute.xlu1 %2561 }
 0x3e4   : > { %v2564_v63 = vunpack.i.h.bf16 %v2562_v62  ;;  %v2563_v0 = vunpack.i.l.bf16 %v2562_v62  ;;  %2424 = vmatprep.subr.bf16.mxu1 %v2423_v61 }
 0x3e5   : > { %2426 = vmatpush3.bf16.msra.mxu1 %v2423_v61 }
 0x3e6   : > { %v2435_v1 = vpack.c.bf16 %v2564_v63, %v2563_v0 }
 0x3e7   : > { %v2567_v2 = vpop.permute.xlu1 %2566 }
 0x3e8   : > { %2436 = vmatprep.subr.bf16.mxu1 %v2435_v1  ;;  %v2569_v6 = vunpack.i.h.bf16 %v2567_v2  ;;  %v2568_v7 = vunpack.i.l.bf16 %v2567_v2 }
 0x3ea   : > { %v2439_v10 = vpack.c.bf16 %v2569_v6, %v2568_v7 }
 0x3eb   : > { %v2572_v3 = vpop.permute.xlu1 %2571 }
 0x3ec   : > { %v2574_v11 = vunpack.i.h.bf16 %v2572_v3  ;;  %v2573_v12 = vunpack.i.l.bf16 %v2572_v3 }
 0x3ee   : > { %v2443_v14 = vpack.c.bf16 %v2574_v11, %v2573_v12 }
 0x3ef   : > { %v2577_v4 = vpop.permute.xlu1 %2576  ;;  %v1634_v9 = vpop.trf.xlu0 }
 0x3f0   : > { %v2579_v16 = vunpack.i.h.bf16 %v2577_v4  ;;  %v2578_v17 = vunpack.i.l.bf16 %v2577_v4 }
 0x3f2   : > { %v2447_v20 = vpack.c.bf16 %v2579_v16, %v2578_v17 }
 0x3f3   : > { %v1635_v18 = vpop.trf.xlu0 }
 0x3f7   : > { %v1636_v21 = vpop.trf.xlu0 }
 0x3fb   : > { %v1637_v22 = vpop.trf.xlu0 }
 0x426   : > { %v1320_v5 = vpop.trf.xlu1 }
 0x427   : > { %2315 = vmatprep.mubr.msk.f32.mxu1 %vm905_vm1, %v1320_v5 }
 0x42a   : > { %v1321_v8 = vpop.trf.xlu1 }
 0x42b   : > { %2316 = vmatmul.mubr.msk.f32.vlgmr.msra.gmra.mrb[16].mxu1 %vm905_vm1, %v1321_v8 }
 0x42c   : > { %2438 = vmatpush3.bf16.msra.mxu1 %v2435_v1 }
 0x42d   : > { %2440 = vmatprep.subr.bf16.mxu1 %v2439_v10 }
 0x42e   : > { %v1322_v13 = vpop.trf.xlu1 }
 0x42f   : > { %2318 = vmatprep.mubr.msk.f32.mxu1 %vm905_vm1, %v1322_v13 }
 0x430   : > { %2442 = vmatpush3.bf16.msra.mxu1 %v2439_v10 }
 0x431   : > { %2444 = vmatprep.subr.bf16.mxu1 %v2443_v14 }
 0x432   : > { %v1323_v19 = vpop.trf.xlu1 }
 0x433   : > { %2319 = vmatmul.mubr.msk.f32.gmra.mrb[18].mxu1 %vm905_vm1, %v1323_v19 }
 0x434   : > { %2446 = vmatpush3.bf16.msra.mxu1 %v2443_v14  ;;  %2357 = vmatprep.mubr.msk.f32.mxu1 %vm905_vm1, %v1634_v9 }
 0x435   : > { %2448 = vmatprep.subr.bf16.mxu1 %v2447_v20 }
 0x438   : > { %2450 = vmatpush3.bf16.msra.mxu1 %v2447_v20 }
 0x43b   : > { %2358 = vmatmul.mubr.msk.f32.vlgmr.msra.gmra.mrb[20].mxu1 %vm905_vm1, %v1635_v18 }
 0x43c   : > { %2360 = vmatprep.mubr.msk.f32.mxu1 %vm905_vm1, %v1636_v21 }
 0x43f   : > { %2361 = vmatmul.mubr.msk.f32.gmra.mrb[22].mxu1 %vm905_vm1, %v1637_v22 }
 0x440   : > { %2593 = shalt.err (!%p2590_p5)
}
 0x441   : > { %s2594_s30 = scalar_lea.hbm %s3087_s1, 512  ;;  %s2598_s25 = scalar_lea.hbm %s3254_s10, 1024 }
 0x442   : > { %p2595_p6 = scmp.ne.s32.totalorder %s3087_s1, %s2594_s30  ;;  %p2599_p10 = scmp.lt.u32.totalorder %s3087_s1, %s3254_s10 }
 0x443   : > { %p2600_p11 = scmp.lt.u32.totalorder %s2598_s25, %s2594_s30  ;;  %p2602_p13 = scmp.lt.u32.totalorder %s2594_s30, %s3087_s1 }
 0x444   : > { %p2596_p7 = pnand %p2595_p6, %p2834_p4 }
 0x445   : > { %p2601_p12 = por %p2600_p11, %p2599_p10 }
 0x446   : > { %p2597_p9 = pneg %p2596_p7 }
 0x447   : > { %p2603_p0 = por %p2602_p13, %p2601_p12 }
 0x449   : > { %p2604_p1 = pnand %p2603_p0, %p2597_p9 }
 0x44b   : > { %2607 = shalt.err (!%p2604_p1)
}
 0x44c   : > { %s3264_s20 = smov 128   ;;  %s2724_s28 = smov 8   ;;  %v1301_v15 = vld [vmem:[%s3043_s18 + $0x8] sm:$0xff]  ;;  %v1300_v23 = vld [vmem:[%s3043_s18] sm:$0xff]  ;;  %v1303_v28 = vld [vmem:[%s3043_s18 + $0x18] sm:$0xff] }
 0x44d   : > { %2451 = dma.vmem_to_hbm [thread:$0]  (%p2834_p4), %s3090_s3, 512, %s3087_s1, %s3094_s29, %s3264_s20, %s3264_s20, %s2724_s28  }
 0x44e   : > { %s3278_s30 = sadd.s32 4294967295, %s2718_s26   ;;  %v1302_v29 = vld [vmem:[%s3043_s18 + $0x10] sm:$0xff]  ;;  %s1827_s1 = sshll.u32 %s3043_s18, 4  ;;  %s3140_s1 = int_to_ptr.vmem [resolvable:$true] %s1827_s1 }
 0x44f   : > { %s3130_s14 = sand.u32 1, %s3278_s30   ;;  %s3138_s0 = scalar_lea.hbm %s3255_s11, %s3081_s27 }
 0x450   : > { %s2608_s24 = scalar_lea.vmem %s3140_s1, 512  ;;  %s2725_s17 = smov [#allocation4]  }
 0x451   : > { %p2609_p2 = scmp.ne.s32.totalorder %s3140_s1, %s2608_s24  ;;  %s2612_s30 = sshll.u32 %s2725_s17, 4  ;;  %s2613_s30 = int_to_ptr.vmem [resolvable:$false] %s2612_s30 }
 0x452   : > { %s2614_s3 = scalar_lea.vmem %s2613_s30, 1024  ;;  %p2615_p6 = scmp.lt.s32.totalorder %s3140_s1, %s2613_s30 }
 0x453   : > { %p2610_p3 = pnand %p2609_p2, %p2834_p4  ;;  %p2616_p7 = scmp.lt.s32.totalorder %s2614_s3, %s2608_s24 }
 0x455   : > { %p2611_p5 = pneg %p2610_p3  ;;  %p2617_p9 = por %p2616_p7, %p2615_p6 }
 0x457   : > { %p2618_p10 = pnand %p2617_p9, %p2611_p5 }
 0x4fe   : > { %v2317_v24 = vpop.f32.mrb[16].mxu1 }
 0x4ff   : > { %v1466_v25 = vadd.f32 %v2317_v24, %v1301_v15  ;;  %v1446_v26 = vpop.f32.mrb[17].mxu1 }
 0x500   : > { %v1465_v27 = vadd.f32 %v1446_v26, %v1300_v23 }
 0x501   : > { %1470 = vst.msk [vmem:[%s3043_s18 + $0x8] sm:$0xff] %vm534_vm0, %v1466_v25 }
 0x502   : > { %1469 = vst.msk [vmem:[%s3043_s18] sm:$0xff] %vm534_vm0, %v1465_v27 }
 0x506   : > { %v2320_v30 = vpop.f32.mrb[18].mxu1 }
 0x507   : > { %v1468_v31 = vadd.f32 %v2320_v30, %v1303_v28  ;;  %v1456_v32 = vpop.f32.mrb[19].mxu1 }
 0x508   : > { %v1467_v33 = vadd.f32 %v1456_v32, %v1302_v29 }
 0x509   : > { %1472 = vst.msk [vmem:[%s3043_s18 + $0x18] sm:$0xff] %vm534_vm0, %v1468_v31 }
 0x50a   : > { %1471 = vst.msk [vmem:[%s3043_s18 + $0x10] sm:$0xff] %vm534_vm0, %v1467_v33 }
 0x50b   : > { %2621 = shalt.err (!%p2618_p10)
}
 0x50c   : > { %s2622_s18 = scalar_lea.hbm %s3138_s0, 512  ;;  %s2626_s17 = scalar_lea.hbm %s3255_s11, 1024 }
 0x50d   : > { %p2623_p11 = scmp.ne.s32.totalorder %s3138_s0, %s2622_s18  ;;  %p2627_p0 = scmp.lt.u32.totalorder %s3138_s0, %s3255_s11 }
 0x50e   : > { %p2628_p1 = scmp.lt.u32.totalorder %s2626_s17, %s2622_s18  ;;  %p2630_p3 = scmp.lt.u32.totalorder %s2622_s18, %s3138_s0 }
 0x50f   : > { %p2624_p12 = pnand %p2623_p11, %p2834_p4 }
 0x510   : > { %p2629_p2 = por %p2628_p1, %p2627_p0 }
 0x511   : > { %p2625_p13 = pneg %p2624_p12 }
 0x512   : > { %p2631_p5 = por %p2630_p3, %p2629_p2 }
 0x514   : > { %p2632_p6 = pnand %p2631_p5, %p2625_p13 }
 0x516   : > { %2635 = shalt.err (!%p2632_p6)
}
 0x517   : > { %s3279_s24 = smov 128   ;;  %s3280_s3 = scalar_lea.sflag [#allocation5], %s3130_s14  ;;  %v1615_v34 = vld [vmem:[%s3066_s19 + $0x8] sm:$0xff]  ;;  %v1614_v35 = vld [vmem:[%s3066_s19] sm:$0xff]  ;;  %v2359_v36 = vpop.f32.mrb[20].mxu1  ;;  %v1617_v40 = vld [vmem:[%s3066_s19 + $0x18] sm:$0xff] }
 0x518   : > { %2452 = dma.vmem_to_hbm [thread:$0]  (%p2834_p4), %s3140_s1, 512, %s3138_s0, %s3280_s3, %s3279_s24, %s3279_s24, %s2724_s28   ;;  %v1780_v37 = vadd.f32 %v2359_v36, %v1615_v34  ;;  %v1760_v38 = vpop.f32.mrb[21].mxu1 }
 0x519   : > { %v1779_v39 = vadd.f32 %v1760_v38, %v1614_v35  ;;  %v1616_v41 = vld [vmem:[%s3066_s19 + $0x10] sm:$0xff]  ;;  %s1843_s20 = sshll.u32 %s3066_s19, 4  ;;  %v2362_v42 = vpop.f32.mrb[22].mxu1  ;;  %s3186_s25 = scalar_lea.hbm %s3256_s12, %s3081_s27  ;;  %s3188_s20 = int_to_ptr.vmem [resolvable:$true] %s1843_s20 }
 0x51a   : > { %1784 = vst.msk [vmem:[%s3066_s19 + $0x8] sm:$0xff] %vm534_vm0, %v1780_v37  ;;  %v1782_v43 = vadd.f32 %v2362_v42, %v1617_v40  ;;  %v1770_v44 = vpop.f32.mrb[23].mxu1  ;;  %s2636_s18 = scalar_lea.vmem %s3188_s20, 512  ;;  %s2726_s29 = smov [#allocation6]  }
 0x51b   : > { %1783 = vst.msk [vmem:[%s3066_s19] sm:$0xff] %vm534_vm0, %v1779_v39  ;;  %v1781_v45 = vadd.f32 %v1770_v44, %v1616_v41  ;;  %p2637_p7 = scmp.ne.s32.totalorder %s3188_s20, %s2636_s18  ;;  %s2640_s17 = sshll.u32 %s2726_s29, 4  ;;  %s2641_s17 = int_to_ptr.vmem [resolvable:$false] %s2640_s17 }
 0x51c   : > { %1786 = vst.msk [vmem:[%s3066_s19 + $0x18] sm:$0xff] %vm534_vm0, %v1782_v43  ;;  %s2642_s30 = scalar_lea.vmem %s2641_s17, 1024  ;;  %p2643_p11 = scmp.lt.s32.totalorder %s3188_s20, %s2641_s17 }
 0x51d   : > { %1785 = vst.msk [vmem:[%s3066_s19 + $0x10] sm:$0xff] %vm534_vm0, %v1781_v45  ;;  %p2638_p9 = pnand %p2637_p7, %p2834_p4  ;;  %p2644_p12 = scmp.lt.s32.totalorder %s2642_s30, %s2636_s18 }
 0x51f   : > { %p2639_p10 = pneg %p2638_p9  ;;  %p2645_p13 = por %p2644_p12, %p2643_p11 }
 0x521   : > { %p2646_p0 = pnand %p2645_p13, %p2639_p10 }
 0x523   : > { %2649 = shalt.err (!%p2646_p0)
}
 0x524   : > { %s2650_s19 = scalar_lea.hbm %s3186_s25, 512  ;;  %s2654_s1 = scalar_lea.hbm %s3256_s12, 1024 }
 0x525   : > { %p2651_p1 = scmp.ne.s32.totalorder %s3186_s25, %s2650_s19  ;;  %p2655_p5 = scmp.lt.u32.totalorder %s3186_s25, %s3256_s12 }
 0x526   : > { %p2656_p6 = scmp.lt.u32.totalorder %s2654_s1, %s2650_s19  ;;  %p2658_p9 = scmp.lt.u32.totalorder %s2650_s19, %s3186_s25 }
 0x527   : > { %p2652_p2 = pnand %p2651_p1, %p2834_p4 }
 0x528   : > { %p2657_p7 = por %p2656_p6, %p2655_p5 }
 0x529   : > { %p2653_p3 = pneg %p2652_p2 }
 0x52a   : > { %p2659_p10 = por %p2658_p9, %p2657_p7 }
 0x52c   : > { %p2660_p11 = pnand %p2659_p10, %p2653_p3 }
 0x52e   : > { %2663 = shalt.err (!%p2660_p11)
}
 0x52f   : > { %s3281_s18 = scalar_lea.sflag [#allocation5], %s3130_s14 }
 0x530   : > { %2453 = dma.vmem_to_hbm [thread:$0]  (%p2834_p4), %s3188_s20, 512, %s3186_s25, %s3281_s18, %s3279_s24, %s3279_s24, %s2724_s28  }
 0x531 PF: > { %p2467_p12 = scmp.ge.s32.totalorder %s2718_s26, 2  ;;  %s1858_s17 = sand.u32 1, %s2698_s21  }
 0x532   : > { %s1859_s30 = scalar_lea.sflag [#allocation3], %s1858_s17 }
 0x533   : > { %p2458_p13 = pnand %p2467_p12, %p2843_p8 }
 0x535   : > { %2689 = dma.done.wait (!%p2458_p13), %s1859_s30, 512  }
 0x536   : > { %2691 = vsyncadd (!%p2458_p13), %s1859_s30, 4294966784  ;;  %s3282_s13 = sadd.s32 4294967294, %s2718_s26  }
 0x537   : > { %s1867_s19 = sand.u32 1, %s3282_s13  }
 0x538   : > { %s1868_s27 = scalar_lea.sflag [#allocation5], %s1867_s19 }
 0x539   : > { %2693 = dma.done.wait (!%p2458_p13), %s1868_s27, 1024  }
 0x53a   : > { %2695 = vsyncadd (!%p2458_p13), %s1868_s27, 4294966272  ;;  %s29_s26 = sadd.s32 1, %s2718_s26   ;;  %s3283_s24 = sld [smem:[#allocation9_spill]] }
 0x53b   : > { %p26_p4 = scmp.ge.s32.totalorder %s29_s26, 4   ;;  %s3284_s25 = sld [smem:[#allocation10_spill]] }
 0x53c   : > { %s3285_s21 = smov %s2702_s22  ;;  %s3286_s22 = smov %s2706_s23 }
 0x53d   : > { %s3287_s23 = smov %s2849_s16  ;;  %28 = sbr.rel (!%p26_p4) target bundleno = 10 (0xa), region = 137 }
 0x544   :  { %1882 = vsyncpa [#allocation3], 1 }
 0x545   :  { %1884 = vsyncpa [#allocation3 + $0x1], 1 }
 0x546   :  { %1885 = vsyncpa [#allocation5], 1 }
 0x547   :  { %1887 = vsyncpa [#allocation5 + $0x1], 1 }

</bundles_post_ra>
